<compile_context>
chip_gen: v5e
topology: v5e:2x2
jax: 0.10.0
libtpu: 0.0.40
codegen_flags: <defaults>
</compile_context>

<pallas_src>
import functools

import jax
import jax.numpy as jnp
from jax.experimental import pallas as pl
from jax.experimental.pallas import tpu as pltpu


def _cdiv(a, b):
    return -(-a // b)


def _round_up(n, m):
    return ((n + m - 1) // m) * m


def _batch_tiling(B, block_b):
    """Pick (tile_rows, num_tiles) for the batch grid.

    Multi-tile blocks are multiples of 8 (sublane); a single block spanning the full
    batch dim is always layout-legal. For large batches the tile count is kept even
    (and >= 2) so both TensorCores of a v7x megacore receive equal work.
    """
    if B <= 1024 and B <= block_b:
        return B, 1
    n = max(2, _cdiv(B, block_b))
    if n % 2:
        n += 1
    tb = _round_up(_cdiv(B, n), 8)
    return tb, _cdiv(B, tb)


def _dqn_kernel(x_ref, w1_ref, b1_ref, w2_ref, b2_ref, w3_ref, b3_ref,
                w4_ref, b4_ref, out_ref):
    # Full f32: MXU handles f32 operands; accumulation forced to f32.
    h = jnp.dot(x_ref[...], w1_ref[...], preferred_element_type=jnp.float32)
    h = jnp.maximum(h + b1_ref[...], 0.0)
    h = jnp.dot(h, w2_ref[...], preferred_element_type=jnp.float32)
    h = jnp.maximum(h + b2_ref[...], 0.0)
    h = jnp.dot(h, w3_ref[...], preferred_element_type=jnp.float32)
    h = jnp.maximum(h + b3_ref[...], 0.0)
    q = jnp.dot(h, w4_ref[...], preferred_element_type=jnp.float32)
    out_ref[...] = (q + b4_ref[...]).astype(out_ref.dtype)  # (TB, action_dim), no pad


@functools.partial(jax.jit, static_argnames=("block_b",))
def dqn_forward(x, params, block_b=2048):
    """x: (B, state_dim) f32. params: f32 (in,out) weights and f32 (1,out) biases."""
    B, state_dim = x.shape
    h1 = params["w1"].shape[1]
    h2 = params["w2"].shape[1]
    action_dim = params["w4"].shape[1]

    tb, n_tiles = _batch_tiling(B, block_b)

    batch_map = lambda i: (i, 0)   # streamed per batch tile (double-buffered)
    const_map = lambda i: (0, 0)   # grid-resident parameters (fetched once)

    w1, b1 = params["w1"], params["b1"]
    w2, b2 = params["w2"], params["b2"]
    w3, b3 = params["w3"], params["b3"]
    w4, b4 = params["w4"], params["b4"]

    param_bytes = sum(int(v.size) * v.dtype.itemsize for v in params.values())
    cost = pl.CostEstimate(
        flops=2 * B * (state_dim * h1 + h1 * h2 + h2 * h2 + h2 * action_dim),
        transcendentals=0,
        bytes_accessed=B * (state_dim + action_dim) * x.dtype.itemsize + param_bytes,
    )

    return pl.pallas_call(
        _dqn_kernel,
        out_shape=jax.ShapeDtypeStruct((B, action_dim), jnp.float32),
        grid=(n_tiles,),
        in_specs=[
            pl.BlockSpec((tb, state_dim), batch_map),
            pl.BlockSpec(w1.shape, const_map),
            pl.BlockSpec(b1.shape, const_map),
            pl.BlockSpec(w2.shape, const_map),
            pl.BlockSpec(b2.shape, const_map),
            pl.BlockSpec(w3.shape, const_map),
            pl.BlockSpec(b3.shape, const_map),
            pl.BlockSpec(w4.shape, const_map),
            pl.BlockSpec(b4.shape, const_map),
        ],
        out_specs=pl.BlockSpec((tb, action_dim), batch_map),
        compiler_params=pltpu.CompilerParams(
            dimension_semantics=("parallel",)),  # shard batch tiles across v7x's 2 TCs
        cost_estimate=cost,
    )(x, w1, b1, w2, b2, w3, b3, w4, b4)


def init_dqn_params(key, state_dim, action_dim, hidden_dim_1, hidden_dim_2):
    """nn.Linear-style init: U(-1/sqrt(fan_in), +1/sqrt(fan_in)); all f32 for torch parity."""
    dims = [(state_dim, hidden_dim_1),
            (hidden_dim_1, hidden_dim_2),
            (hidden_dim_2, hidden_dim_2),
            (hidden_dim_2, action_dim)]
    params = {}
    for i, (din, dout) in enumerate(dims, start=1):
        key, kw, kb = jax.random.split(key, 3)
        bound = 1.0 / (din ** 0.5)
        params[f"w{i}"] = jax.random.uniform(
            kw, (din, dout), jnp.float32, minval=-bound, maxval=bound)
        params[f"b{i}"] = jax.random.uniform(
            kb, (1, dout), jnp.float32, minval=-bound, maxval=bound)
    return params


def dqn_reference(x, params):
    """Pure-JAX f32 reference (HIGHEST matmul precision so the reference is not the sloppy side)."""
    def dense(h, w, b, relu):
        y = jnp.dot(h, w, precision=jax.lax.Precision.HIGHEST) + b
        return jnp.maximum(y, 0.0) if relu else y
    h = dense(x, params["w1"], params["b1"], True)
    h = dense(h, params["w2"], params["b2"], True)
    h = dense(h, params["w3"], params["b3"], True)
    return dense(h, params["w4"], params["b4"], False)


if __name__ == "__main__":
    # Shapes consistent with the module: state_dim=8, action_dim=4, hidden=32.
    B, STATE_DIM, ACTION_DIM, H1, H2 = 2, 8, 4, 32, 32

    key = jax.random.PRNGKey(0)
    key, kx = jax.random.split(key)
    x = jax.random.normal(kx, (B, STATE_DIM), dtype=jnp.float32)
    params = init_dqn_params(key, STATE_DIM, ACTION_DIM, H1, H2)

    q = jax.block_until_ready(dqn_forward(x, params))
    q_ref = dqn_reference(x, params)
    assert q.shape == (B, ACTION_DIM)
    assert jnp.allclose(q, q_ref, atol=2e-3, rtol=2e-3), "mismatch vs reference (small batch)"

    # Multi-tile path: even grid (6 tiles of 176 rows), ragged last block, no wrapper pad.
    key, kx2 = jax.random.split(key)
    xb = jax.random.normal(kx2, (1040, STATE_DIM), dtype=jnp.float32)
    qb = jax.block_until_ready(dqn_forward(xb, params, block_b=256))
    qb_ref = dqn_reference(xb, params)
    assert qb.shape == (1040, ACTION_DIM)
    assert jnp.allclose(qb, qb_ref, atol=2e-3, rtol=2e-3), "mismatch vs reference (tiled batch)"

    print("KERNEL_OK")
</pallas_src>

<mosaic_0001>
module attributes {stable_mosaic.version = 11 : i64} {
  func.func @_dqn_kernel(%arg0: i32, %arg1: memref<2x8xf32, #tpu.memory_space<vmem>>, %arg2: memref<8x32xf32, #tpu.memory_space<vmem>>, %arg3: memref<1x32xf32, #tpu.memory_space<vmem>>, %arg4: memref<32x32xf32, #tpu.memory_space<vmem>>, %arg5: memref<1x32xf32, #tpu.memory_space<vmem>>, %arg6: memref<32x32xf32, #tpu.memory_space<vmem>>, %arg7: memref<1x32xf32, #tpu.memory_space<vmem>>, %arg8: memref<32x4xf32, #tpu.memory_space<vmem>>, %arg9: memref<1x4xf32, #tpu.memory_space<vmem>>, %arg10: memref<2x4xf32, #tpu.memory_space<vmem>>) attributes {dimension_semantics = [#tpu.dimension_semantics<parallel>], iteration_bounds = array<i64: 1>, scalar_prefetch = 0 : i64, scratch_operands = 0 : i64, tpu.core_type = #tpu.core_type<tc>, window_params = [{transform_indices = @transform_0, window_bounds = array<i64: 2, 8>}, {pipeline_mode = #tpu.pipeline_mode<synchronous>, transform_indices = @transform_1, window_bounds = array<i64: 8, 32>}, {pipeline_mode = #tpu.pipeline_mode<synchronous>, transform_indices = @transform_2, window_bounds = array<i64: 1, 32>}, {pipeline_mode = #tpu.pipeline_mode<synchronous>, transform_indices = @transform_3, window_bounds = array<i64: 32, 32>}, {pipeline_mode = #tpu.pipeline_mode<synchronous>, transform_indices = @transform_4, window_bounds = array<i64: 1, 32>}, {pipeline_mode = #tpu.pipeline_mode<synchronous>, transform_indices = @transform_5, window_bounds = array<i64: 32, 32>}, {pipeline_mode = #tpu.pipeline_mode<synchronous>, transform_indices = @transform_6, window_bounds = array<i64: 1, 32>}, {pipeline_mode = #tpu.pipeline_mode<synchronous>, transform_indices = @transform_7, window_bounds = array<i64: 32, 4>}, {pipeline_mode = #tpu.pipeline_mode<synchronous>, transform_indices = @transform_8, window_bounds = array<i64: 1, 4>}, {transform_indices = @transform_9, window_bounds = array<i64: 2, 4>}]} {
    %c0 = arith.constant 0 : index
    %c0_0 = arith.constant 0 : index
    %0 = vector.load %arg1[%c0, %c0_0] : memref<2x8xf32, #tpu.memory_space<vmem>>, vector<2x8xf32>
    %c0_1 = arith.constant 0 : index
    %c0_2 = arith.constant 0 : index
    %1 = vector.load %arg2[%c0_1, %c0_2] : memref<8x32xf32, #tpu.memory_space<vmem>>, vector<8x32xf32>
    %cst = arith.constant dense<0.000000e+00> : vector<2x32xf32>
    %2 = tpu.matmul %0, %1, %cst {dimension_numbers = #tpu.dot_dimension_numbers<[1], [0], [0], [1], [0, 0, 1, 1], [], []>} : vector<2x8xf32>, vector<8x32xf32>, vector<2x32xf32> -> vector<2x32xf32>
    %c0_3 = arith.constant 0 : index
    %c0_4 = arith.constant 0 : index
    %3 = vector.load %arg3[%c0_3, %c0_4] : memref<1x32xf32, #tpu.memory_space<vmem>>, vector<1x32xf32>
    %4 = vector.broadcast %3 : vector<1x32xf32> to vector<2x32xf32>
    %5 = arith.addf %2, %4 : vector<2x32xf32>
    %cst_5 = arith.constant 0.000000e+00 : f32
    %6 = vector.broadcast %cst_5 : f32 to vector<2x32xf32>
    %7 = arith.maximumf %5, %6 : vector<2x32xf32>
    %c0_6 = arith.constant 0 : index
    %c0_7 = arith.constant 0 : index
    %8 = vector.load %arg4[%c0_6, %c0_7] : memref<32x32xf32, #tpu.memory_space<vmem>>, vector<32x32xf32>
    %cst_8 = arith.constant dense<0.000000e+00> : vector<2x32xf32>
    %9 = tpu.matmul %7, %8, %cst_8 {dimension_numbers = #tpu.dot_dimension_numbers<[1], [0], [0], [1], [0, 0, 1, 1], [], []>} : vector<2x32xf32>, vector<32x32xf32>, vector<2x32xf32> -> vector<2x32xf32>
    %c0_9 = arith.constant 0 : index
    %c0_10 = arith.constant 0 : index
    %10 = vector.load %arg5[%c0_9, %c0_10] : memref<1x32xf32, #tpu.memory_space<vmem>>, vector<1x32xf32>
    %11 = vector.broadcast %10 : vector<1x32xf32> to vector<2x32xf32>
    %12 = arith.addf %9, %11 : vector<2x32xf32>
    %cst_11 = arith.constant 0.000000e+00 : f32
    %13 = vector.broadcast %cst_11 : f32 to vector<2x32xf32>
    %14 = arith.maximumf %12, %13 : vector<2x32xf32>
    %c0_12 = arith.constant 0 : index
    %c0_13 = arith.constant 0 : index
    %15 = vector.load %arg6[%c0_12, %c0_13] : memref<32x32xf32, #tpu.memory_space<vmem>>, vector<32x32xf32>
    %cst_14 = arith.constant dense<0.000000e+00> : vector<2x32xf32>
    %16 = tpu.matmul %14, %15, %cst_14 {dimension_numbers = #tpu.dot_dimension_numbers<[1], [0], [0], [1], [0, 0, 1, 1], [], []>} : vector<2x32xf32>, vector<32x32xf32>, vector<2x32xf32> -> vector<2x32xf32>
    %c0_15 = arith.constant 0 : index
    %c0_16 = arith.constant 0 : index
    %17 = vector.load %arg7[%c0_15, %c0_16] : memref<1x32xf32, #tpu.memory_space<vmem>>, vector<1x32xf32>
    %18 = vector.broadcast %17 : vector<1x32xf32> to vector<2x32xf32>
    %19 = arith.addf %16, %18 : vector<2x32xf32>
    %cst_17 = arith.constant 0.000000e+00 : f32
    %20 = vector.broadcast %cst_17 : f32 to vector<2x32xf32>
    %21 = arith.maximumf %19, %20 : vector<2x32xf32>
    %c0_18 = arith.constant 0 : index
    %c0_19 = arith.constant 0 : index
    %22 = vector.load %arg8[%c0_18, %c0_19] : memref<32x4xf32, #tpu.memory_space<vmem>>, vector<32x4xf32>
    %cst_20 = arith.constant dense<0.000000e+00> : vector<2x4xf32>
    %23 = tpu.matmul %21, %22, %cst_20 {dimension_numbers = #tpu.dot_dimension_numbers<[1], [0], [0], [1], [0, 0, 1, 1], [], []>} : vector<2x32xf32>, vector<32x4xf32>, vector<2x4xf32> -> vector<2x4xf32>
    %c0_21 = arith.constant 0 : index
    %c0_22 = arith.constant 0 : index
    %24 = vector.load %arg9[%c0_21, %c0_22] : memref<1x4xf32, #tpu.memory_space<vmem>>, vector<1x4xf32>
    %25 = vector.broadcast %24 : vector<1x4xf32> to vector<2x4xf32>
    %26 = arith.addf %23, %25 : vector<2x4xf32>
    %c0_23 = arith.constant 0 : index
    %c0_24 = arith.constant 0 : index
    %27 = vector.load %arg10[%c0_23, %c0_24] : memref<2x4xf32, #tpu.memory_space<vmem>>, vector<2x4xf32>
    tpu.vector_store %arg10[%c0_23, %c0_24], %26 {strides = array<i32>} : memref<2x4xf32, #tpu.memory_space<vmem>>, vector<2x4xf32>,
    return
  }
  func.func @transform_0(%arg0: i32) -> (i32, i32) {
    %c0_i32 = arith.constant 0 : i32
    %c0_i32_0 = arith.constant 0 : i32
    return %arg0, %c0_i32 : i32, i32
  }
  func.func @transform_1(%arg0: i32) -> (i32, i32) {
    %c0_i32 = arith.constant 0 : i32
    %c0_i32_0 = arith.constant 0 : i32
    %c0_i32_1 = arith.constant 0 : i32
    return %c0_i32, %c0_i32_0 : i32, i32
  }
  func.func @transform_2(%arg0: i32) -> (i32, i32) {
    %c0_i32 = arith.constant 0 : i32
    %c0_i32_0 = arith.constant 0 : i32
    %c0_i32_1 = arith.constant 0 : i32
    return %c0_i32, %c0_i32_0 : i32, i32
  }
  func.func @transform_3(%arg0: i32) -> (i32, i32) {
    %c0_i32 = arith.constant 0 : i32
    %c0_i32_0 = arith.constant 0 : i32
    %c0_i32_1 = arith.constant 0 : i32
    return %c0_i32, %c0_i32_0 : i32, i32
  }
  func.func @transform_4(%arg0: i32) -> (i32, i32) {
    %c0_i32 = arith.constant 0 : i32
    %c0_i32_0 = arith.constant 0 : i32
    %c0_i32_1 = arith.constant 0 : i32
    return %c0_i32, %c0_i32_0 : i32, i32
  }
  func.func @transform_5(%arg0: i32) -> (i32, i32) {
    %c0_i32 = arith.constant 0 : i32
    %c0_i32_0 = arith.constant 0 : i32
    %c0_i32_1 = arith.constant 0 : i32
    return %c0_i32, %c0_i32_0 : i32, i32
  }
  func.func @transform_6(%arg0: i32) -> (i32, i32) {
    %c0_i32 = arith.constant 0 : i32
    %c0_i32_0 = arith.constant 0 : i32
    %c0_i32_1 = arith.constant 0 : i32
    return %c0_i32, %c0_i32_0 : i32, i32
  }
  func.func @transform_7(%arg0: i32) -> (i32, i32) {
    %c0_i32 = arith.constant 0 : i32
    %c0_i32_0 = arith.constant 0 : i32
    %c0_i32_1 = arith.constant 0 : i32
    return %c0_i32, %c0_i32_0 : i32, i32
  }
  func.func @transform_8(%arg0: i32) -> (i32, i32) {
    %c0_i32 = arith.constant 0 : i32
    %c0_i32_0 = arith.constant 0 : i32
    %c0_i32_1 = arith.constant 0 : i32
    return %c0_i32, %c0_i32_0 : i32, i32
  }
  func.func @transform_9(%arg0: i32) -> (i32, i32) {
    %c0_i32 = arith.constant 0 : i32
    %c0_i32_0 = arith.constant 0 : i32
    return %arg0, %c0_i32 : i32, i32
  }
}

</mosaic_0001>

<bundles_post_ra>
// kernel: dqn_forward.1
= control target key start
LH: loop header
LB: loop body
LE: loop exit
PB: predicated region body
PF: predicated region fallthrough
CT: control target
= control target key end

     0   :  { %14 = vsyncpa [#allocation3], 0  ;;  %s528_s0 = inlined_call_operand.hbm [shape: f32[2,8], index: 0, kind: input, shape index: {}]   ;;  %s529_s1 = inlined_call_operand.vmem [shape: f32[8,32], index: 1, kind: input, shape index: {}]   ;;  %s530_s2 = inlined_call_operand.vmem [shape: f32[1,32], index: 2, kind: input, shape index: {}]   ;;  %s531_s3 = inlined_call_operand.vmem [shape: f32[32,32], index: 3, kind: input, shape index: {}]   ;;  %s532_s4 = inlined_call_operand.hbm [shape: f32[1,32], index: 4, kind: input, shape index: {}]   ;;  %s533_s5 = inlined_call_operand.hbm [shape: f32[32,32], index: 5, kind: input, shape index: {}]   ;;  %s534_s6 = inlined_call_operand.hbm [shape: f32[1,32], index: 6, kind: input, shape index: {}]   ;;  %s535_s7 = inlined_call_operand.vmem [shape: f32[32,4], index: 7, kind: input, shape index: {}]   ;;  %s536_s8 = inlined_call_operand.hbm [shape: f32[1,4], index: 8, kind: input, shape index: {}]   ;;  %s537_s9 = inlined_call_operand.hbm [shape: f32[2,4], index: 9, kind: output, shape index: {}]  }
   0x1   :  { %15 = vsyncpa [#allocation6], 0 }
   0x2   :  { %16 = vsyncpa [#allocation9], 0  ;;  %s40_s11 = sshll.u32 %s532_s4, 4  ;;  %s41_s11 = int_to_ptr.hbm [resolvable:$true] %s40_s11 }
   0x3   :  { %17 = vsyncpa [#allocation4], 0  ;;  %s419_s12 = smov [#allocation5]   ;;  %s64_s16 = sshll.u32 %s534_s6, 4  ;;  %s65_s16 = int_to_ptr.hbm [resolvable:$true] %s64_s16 }
   0x4   :  { %s42_s13 = sshll.u32 %s419_s12, 4  ;;  %s420_s17 = smov [#allocation8]   ;;  %s43_s13 = int_to_ptr.vmem [resolvable:$true] %s42_s13 }
   0x5   :  { %45 = dma.hbm_to_vmem [thread:$0]  %s41_s11, 16, %s43_s13, [#allocation6]  }
   0x6   :  { %s66_s18 = sshll.u32 %s420_s17, 4  ;;  %s23_s21 = sshll.u32 %s528_s0, 4  ;;  %s67_s18 = int_to_ptr.vmem [resolvable:$true] %s66_s18  ;;  %s24_s21 = int_to_ptr.hbm [resolvable:$true] %s23_s21 }
   0x7   :  { %69 = dma.hbm_to_vmem [thread:$0]  %s65_s16, 16, %s67_s18, [#allocation9]  }
   0x8   :  { %s50_s23 = sshll.u32 %s533_s5, 4  ;;  %s421_s24 = smov [#allocation2]   ;;  %s51_s23 = int_to_ptr.hbm [resolvable:$true] %s50_s23 }
   0x9   :  { %s25_s25 = sshll.u32 %s421_s24, 4  ;;  %s422_s6 = smov [#allocation7]   ;;  %s26_s25 = int_to_ptr.vmem [resolvable:$true] %s25_s25 }
   0xa   :  { %28 = dma.hbm_to_vmem [thread:$0]  %s24_s21, 32, %s26_s25, [#allocation3]  }
   0xb   :  { %s52_s26 = sshll.u32 %s422_s6, 4  ;;  %s423_s27 = smov 128   ;;  %s53_s26 = int_to_ptr.vmem [resolvable:$true] %s52_s26 }
   0xc   :  { %s424_s28 = smov 8   ;;  %s77_s30 = sshll.u32 %s536_s8, 4  ;;  %s78_s30 = int_to_ptr.hbm [resolvable:$true] %s77_s30 }
   0xd   :  { %58 = dma.hbm_to_vmem [thread:$0]  %s51_s23, 512, %s53_s26, [#allocation6], %s423_s27, %s423_s27, %s424_s28  }
   0xe   :  { %s425_s10 = smov [#allocation10]  }
   0xf   :  { %s79_s11 = sshll.u32 %s425_s10, 4  ;;  %s80_s11 = int_to_ptr.vmem [resolvable:$true] %s79_s11 }
  0x10   :  { %82 = dma.hbm_to_vmem [thread:$0]  %s78_s30, 16, %s80_s11, [#allocation9]  }
  0x11   :  { %411 = dma.done.wait [#allocation3], 32  }
  0x12   :  { %412 = vsyncadd [#allocation3], 4294967264 }
  0x13   :  { %413 = dma.done.wait [#allocation6], 528  }
  0x14   :  { %414 = vsyncadd [#allocation6], 4294966768 }
  0x15   :  { %415 = dma.done.wait [#allocation9], 32  }
  0x16   :  { %416 = vsyncadd [#allocation9], 4294967264  ;;  %vm109_vm0 = vcmask 64512   ;;  %v104_v0 = vld [vmem:[%s529_s1] sm:$0xff]  ;;  %v137_v2 = vld [vmem:[%s531_s3 + $0x18] sm:$0xff]  ;;  %vm142_vm1 = vcmask 261120  }
  0x17   :  { %v103_v1 = vld [vmem:[#allocation2] sm:$0x3]  ;;  %128 = vmatpush.msra.mxu0 %v104_v0  ;;  %158 = vmatpush.msra.mxu1 %v137_v2  ;;  %v136_v3 = vld [vmem:[%s531_s3 + $0x10] sm:$0xff]  ;;  %v135_v4 = vld [vmem:[%s531_s3 + $0x8] sm:$0xff]  ;;  %s426_s6 = smov [#allocation11]   ;;  %s239_s29 = sshll.u32 %s537_s9, 4  ;;  %s240_s29 = int_to_ptr.hbm [resolvable:$true] %s239_s29 }
  0x18   :  { %251 = vmatmul.msk.f32.vlgmr.msra.gmra.mxu0 %vm109_vm0, %v103_v1  ;;  %v134_v5 = vld [vmem:[%s531_s3] sm:$0xff]  ;;  %v169_v11 = vld [vmem:[#allocation7 + $0x10] sm:$0xff]  ;;  %v168_v12 = vld [vmem:[#allocation7 + $0x8] sm:$0xff]  ;;  %s237_s26 = sshll.u32 %s426_s6, 4  ;;  %vm230_vm2 = vcmask 25600   ;;  %s238_s26 = int_to_ptr.vmem [resolvable:$true] %s237_s26 }
  0x19   :  { %159 = vmatpush.msra.mxu1 %v136_v3  ;;  %v170_v6 = vld [vmem:[#allocation7 + $0x18] sm:$0xff]  ;;  %v167_v13 = vld [vmem:[#allocation7] sm:$0xff]  ;;  %v201_v19 = vld [vmem:[%s535_s7 + $0x10] sm:$0xff] }
  0x1a   :  { %190 = vmatpush.msra.mxu2 %v170_v6  ;;  %v263_v7 = vld [vmem:[%s530_s2] ss:$0 sm:$0xff]  ;;  %v202_v14 = vld [vmem:[%s535_s7 + $0x18] sm:$0xff]  ;;  %v264_v15 = vld [vmem:[#allocation5] ss:$0 sm:$0xff] }
  0x1b   :  { %160 = vmatpush.msra.mxu1 %v135_v4  ;;  %222 = vmatpush.msra.mxu3 %v202_v14  ;;  %v200_v20 = vld [vmem:[%s535_s7 + $0x8] sm:$0xff]  ;;  %v199_v21 = vld [vmem:[%s535_s7] sm:$0xff] }
  0x1c   :  { %191 = vmatpush.msra.mxu2 %v169_v11  ;;  %v265_v22 = vld [vmem:[#allocation8] ss:$0 sm:$0xff]  ;;  %v266_v26 = vld [vmem:[#allocation10] ss:$0 sm:$0xff] }
  0x1d   :  { %161 = vmatpush.msra.mxu1 %v134_v5  ;;  %223 = vmatpush.msra.mxu3 %v201_v19 }
  0x1e   :  { %192 = vmatpush.msra.mxu2 %v168_v12 }
  0x1f   :  { %224 = vmatpush.msra.mxu3 %v200_v20 }
  0x20   :  { %193 = vmatpush.msra.mxu2 %v167_v13 }
  0x21   :  { %225 = vmatpush.msra.mxu3 %v199_v21 }
  0x95   :  { %v130_v8 = vpop.f32.mrf.mxu0 }
  0x96   :  { %v131_v9 = vadd.f32 %v263_v7, %v130_v8 }
  0x98   :  { %v133_v10 = vmax.f32 %v131_v9, 0.0 }
  0x9a   :  { %252 = vmatmul.msk.f32.vlgmr.msra.gmra.mxu1 %vm142_vm1, %v133_v10 }
 0x117   :  { %v163_v16 = vpop.f32.mrf.mxu1 }
 0x118   :  { %v164_v17 = vadd.f32 %v264_v15, %v163_v16 }
 0x11a   :  { %v166_v18 = vmax.f32 %v164_v17, 0.0 }
 0x11c   :  { %253 = vmatmul.msk.f32.vlgmr.msra.gmra.mxu2 %vm142_vm1, %v166_v18 }
 0x19f   :  { %v195_v23 = vpop.f32.mrf.mxu2 }
 0x1a0   :  { %v196_v24 = vadd.f32 %v265_v22, %v195_v23 }
 0x1a2   :  { %v198_v25 = vmax.f32 %v196_v24, 0.0 }
 0x1a4   :  { %254 = vmatmul.msk.f32.vlgmr.msra.gmra.mxu3 %vm142_vm1, %v198_v25 }
 0x227   :  { %v227_v27 = vpop.f32.mrf.mxu3 }
 0x228   :  { %v228_v28 = vadd.f32 %v266_v26, %v227_v27 }
 0x22a   :  { %231 = vst.msk [vmem:[#allocation11] sm:$0x3] %vm230_vm2, %v228_v28 }
 0x22b   :  { %242 = dma.vmem_to_hbm [thread:$0]  %s238_s26, 32, %s240_s29, [#allocation4]  }
 0x22c   :  { %417 = dma.done.wait [#allocation4], 32  }
 0x22d   :  { %418 = vsyncadd [#allocation4], 4294967264 }
 0x22e   :  { %247 = vsyncpa [#allocation3], 1 }
 0x22f   :  { %248 = vsyncpa [#allocation6], 1 }
 0x230   :  { %249 = vsyncpa [#allocation9], 1 }
 0x231   :  { %250 = vsyncpa [#allocation4], 1 }

</bundles_post_ra>
